<compile_context>
chip_gen: v7x
topology: tpu7x:2x2x1
jax: 0.10.0
libtpu: 0.0.40
codegen_flags: <defaults>
</compile_context>

<pallas_src>
import jax
import jax.numpy as jnp
from jax.experimental import pallas as pl
from jax.experimental.pallas import tpu as pltpu


def _round_up(n, m):
    return ((n + m - 1) // m) * m


def _cdiv(a, b):
    return (a + b - 1) // b


def _detect_vmem_bytes():
    """Physical VMEM per TensorCore; conservative 64 MiB fallback (v7x-safe)."""
    try:
        info = pltpu.get_tpu_info()
        for attr in ("vmem_capacity_bytes", "vmem_size_bytes", "vmem_bytes"):
            v = getattr(info, attr, None)
            if v:
                return int(v)
    except Exception:
        pass
    return 64 << 20


def ffn_kernel(x_ref, w1_ref, b1_ref, w2_ref, b2_ref, gamma_ref, beta_ref,
               o_ref, acc_ref):
    k = pl.program_id(1)

    @pl.when(k == 0)
    def _():
        acc_ref[...] = jnp.zeros_like(acc_ref)

    # x tile stays resident across the k (d_hid) axis; cast to the weight dtype so
    # bf16 weights keep the fast bf16 MXU path (no-op when dtypes already match).
    x = x_ref[...]                                                     # (tm, d_in)

    # ---- chunk of w_1 + bias + ReLU (f32 accumulation) ----
    h = jnp.dot(x.astype(w1_ref.dtype), w1_ref[...],
                preferred_element_type=jnp.float32)                    # (tm, tk) f32
    h = jnp.maximum(h + b1_ref[...], 0.0)                              # b1 chunk is f32

    # ---- accumulate chunk of w_2 into the f32 accumulator ----
    acc_ref[...] += jnp.dot(h.astype(w2_ref.dtype), w2_ref[...],
                            preferred_element_type=jnp.float32)        # (tm, d_in) f32

    # TODO(synk): training-mode dropout (pltpu.prng_random_bits mask) not implemented;
    # eval-mode dropout is identity, matching module.eval().

    @pl.when(k == pl.num_programs(1) - 1)
    def _():
        # ---- bias2 + residual + LayerNorm (eps=1e-6, biased variance, affine) ----
        y = acc_ref[...] + b2_ref[...] + x.astype(jnp.float32)
        mean = jnp.mean(y, axis=-1, keepdims=True)
        centered = y - mean
        var = jnp.mean(centered * centered, axis=-1, keepdims=True)
        inv = jax.lax.rsqrt(var + 1e-6)                                # EUP, not VALU divide
        out = centered * inv * gamma_ref[...] + beta_ref[...]
        o_ref[...] = out.astype(o_ref.dtype)


def positionwise_feed_forward(x, w1, b1, w2, b2, gamma, beta, *,
                              tile_rows=None, hid_tile=None,
                              cast_weights_to_bf16=False,
                              vmem_limit_bytes=None):
    """x: (B, S, d_in); w1: (d_in, d_hid); w2: (d_hid, d_in); b1/b2/gamma/beta: 1-D.

    Weights stored as (in_features, out_features) so the kernel does plain row-major
    matmuls: h = relu(x @ W1 + b1); y = h @ W2 + b2; out = LN(y + x).
    """
    B, S, d_in = x.shape
    d_hid = w1.shape[1]
    assert d_in % 128 == 0 and d_hid % 128 == 0, (
        "d_in and d_hid must be multiples of 128 (lane-dense TPU layout)")

    if cast_weights_to_bf16:
        w1 = w1.astype(jnp.bfloat16)
        w2 = w2.astype(jnp.bfloat16)

    N = B * S
    x2d = x.reshape(N, d_in)                      # contiguous reshape: no HBM copy

    x_bytes = jnp.dtype(x.dtype).itemsize
    w_bytes = jnp.dtype(w1.dtype).itemsize

    # ---- per-generation VMEM budget (no hard 64 MiB clamp on v5e/v6e) ----
    vmem_cap = _detect_vmem_bytes()
    if vmem_limit_bytes is None:
        vmem_limit_bytes = int(vmem_cap * 0.85)   # ~108 MiB on 128 MiB chips, ~54 MiB on v7x
    usable = int(vmem_limit_bytes)

    # Row tile: sublane-packing alignment per dtype (8 f32 / 16 bf16 / 32 int8-fp8).
    row_align = max(8, 32 // x_bytes)
    if tile_rows is None:
        tile_rows = 512 if usable >= (96 << 20) else 256
    tile_rows = _round_up(max(row_align, tile_rows), row_align)
    tile_rows = min(tile_rows, _round_up(N, row_align))

    # Keep >= 2 row blocks when possible so the "parallel" axis can feed both v7x
    # TensorCores (and the pipeline has something to overlap).
    if _cdiv(N, tile_rows) < 2:
        half = _round_up(_cdiv(N, 2), row_align)
        if row_align <= half < tile_rows:
            tile_rows = half

    # ---- d_hid reduction tile: largest multiple-of-128 divisor of d_hid whose
    #      double-buffered W1/W2 chunks + f32 intermediates fit the VMEM budget. ----
    def _fits(tk):
        weights = 2 * 2 * d_in * tk * w_bytes          # W1 + W2 chunks, double-buffered
        io = 2 * 2 * tile_rows * d_in * x_bytes        # x + out tiles, double-buffered
        acc = tile_rows * d_in * 4                     # f32 accumulator scratch
        h = tile_rows * tk * 4                         # f32 intermediate h chunk
        vecs = 2 * 4 * (tk + 3 * d_in)                 # b1 chunk + b2/gamma/beta (f32)
        return weights + io + acc + h + vecs + (4 << 20) <= usable

    if hid_tile is None:
        hid_tile = 128
        t = 128
        while t <= d_hid:
            if d_hid % t == 0 and _fits(t):
                hid_tile = t
            t += 128
    assert d_hid % hid_tile == 0, "hid_tile must divide d_hid (exact reduction tiling)"

    # Pre-cast the small per-feature vectors to f32 once (outside the grid body).
    b1_2d = b1.reshape(1, d_hid).astype(jnp.float32)
    b2_2d = b2.reshape(1, d_in).astype(jnp.float32)
    gamma_2d = gamma.reshape(1, d_in).astype(jnp.float32)
    beta_2d = beta.reshape(1, d_in).astype(jnp.float32)

    grid = (_cdiv(N, tile_rows), d_hid // hid_tile)

    # ---- Cost estimate so XLA doesn't treat the custom call as free. ----
    flops = 4 * N * d_in * d_hid                                      # two matmuls
    bytes_accessed = (
        2 * N * d_in * x_bytes                                        # x in + out
        + 2 * d_in * d_hid * w_bytes                                  # W1 + W2
        + 4 * (d_hid + 3 * d_in))                                     # f32 b1,b2,gamma,beta
    cost = pl.CostEstimate(flops=int(flops),
                           transcendentals=int(N),                    # one rsqrt per row
                           bytes_accessed=int(bytes_accessed))

    out2d = pl.pallas_call(
        ffn_kernel,
        out_shape=jax.ShapeDtypeStruct((N, d_in), x.dtype),
        grid_spec=pltpu.PrefetchScalarGridSpec(
            num_scalar_prefetch=0,
            grid=grid,
            in_specs=[
                pl.BlockSpec((tile_rows, d_in), lambda i, k: (i, 0)),   # x tile (const over k)
                pl.BlockSpec((d_in, hid_tile), lambda i, k: (0, k)),    # W1 chunk
                pl.BlockSpec((1, hid_tile), lambda i, k: (0, k)),       # b1 chunk (f32)
                pl.BlockSpec((hid_tile, d_in), lambda i, k: (k, 0)),    # W2 chunk
                pl.BlockSpec((1, d_in), lambda i, k: (0, 0)),           # b2 (f32)
                pl.BlockSpec((1, d_in), lambda i, k: (0, 0)),           # gamma (f32)
                pl.BlockSpec((1, d_in), lambda i, k: (0, 0)),           # beta (f32)
            ],
            out_specs=pl.BlockSpec((tile_rows, d_in), lambda i, k: (i, 0)),
            scratch_shapes=[pltpu.VMEM((tile_rows, d_in), jnp.float32)],
        ),
        compiler_params=pltpu.CompilerParams(
            dimension_semantics=("parallel", "arbitrary"),
            vmem_limit_bytes=int(vmem_limit_bytes),
        ),
        cost_estimate=cost,
    )(x2d, w1, b1_2d, w2, b2_2d, gamma_2d, beta_2d)

    return out2d.reshape(B, S, d_in)


def reference(x, w1, b1, w2, b2, gamma, beta):
    h = jnp.maximum(jnp.dot(x, w1) + b1, 0.0)
    y = jnp.dot(h, w2) + b2
    y = y + x
    mean = jnp.mean(y, axis=-1, keepdims=True)
    var = jnp.mean((y - mean) ** 2, axis=-1, keepdims=True)
    return (y - mean) / jnp.sqrt(var + 1e-6) * gamma + beta


if __name__ == "__main__":
    # Small, lane-dense shapes consistent with the module's forward: (batch, seq, d_in).
    B, S, d_in, d_hid = 2, 8, 128, 256

    key = jax.random.PRNGKey(0)
    kx, k1, kb1, k2, kb2 = jax.random.split(key, 5)

    x = jax.random.normal(kx, (B, S, d_in), dtype=jnp.float32)

    # Deterministic parameter init (Linear weights stored as (in, out)).
    w1 = jax.random.normal(k1, (d_in, d_hid), dtype=jnp.float32) * 0.05
    b1 = jax.random.normal(kb1, (d_hid,), dtype=jnp.float32) * 0.05
    w2 = jax.random.normal(k2, (d_hid, d_in), dtype=jnp.float32) * 0.05
    b2 = jax.random.normal(kb2, (d_in,), dtype=jnp.float32) * 0.05
    gamma = jnp.ones((d_in,), dtype=jnp.float32)
    beta = jnp.zeros((d_in,), dtype=jnp.float32)

    out = positionwise_feed_forward(x, w1, b1, w2, b2, gamma, beta)
    out = jax.block_until_ready(out)

    ref = reference(x, w1, b1, w2, b2, gamma, beta)
    assert out.shape == (B, S, d_in)
    assert jnp.allclose(out, ref, atol=1e-5, rtol=1e-5), "mismatch vs reference"

    print("KERNEL_OK")
</pallas_src>

<mosaic_0001>
module attributes {stable_mosaic.version = 11 : i64} {
  func.func @ffn_kernel(%arg0: i32, %arg1: i32, %arg2: memref<8x128xf32, #tpu.memory_space<vmem>>, %arg3: memref<128x256xf32, #tpu.memory_space<vmem>>, %arg4: memref<1x256xf32, #tpu.memory_space<vmem>>, %arg5: memref<256x128xf32, #tpu.memory_space<vmem>>, %arg6: memref<1x128xf32, #tpu.memory_space<vmem>>, %arg7: memref<1x128xf32, #tpu.memory_space<vmem>>, %arg8: memref<1x128xf32, #tpu.memory_space<vmem>>, %arg9: memref<8x128xf32, #tpu.memory_space<vmem>>, %arg10: memref<8x128xf32, #tpu.memory_space<vmem>>) attributes {dimension_semantics = [#tpu.dimension_semantics<parallel>, #tpu.dimension_semantics<arbitrary>], iteration_bounds = array<i64: 2, 1>, scalar_prefetch = 0 : i64, scratch_operands = 1 : i64, tpu.core_type = #tpu.core_type<tc>, window_params = [{transform_indices = @transform_0, window_bounds = array<i64: 8, 128>}, {transform_indices = @transform_1, window_bounds = array<i64: 128, 256>}, {transform_indices = @transform_2, window_bounds = array<i64: 1, 256>}, {transform_indices = @transform_3, window_bounds = array<i64: 256, 128>}, {pipeline_mode = #tpu.pipeline_mode<synchronous>, transform_indices = @transform_4, window_bounds = array<i64: 1, 128>}, {pipeline_mode = #tpu.pipeline_mode<synchronous>, transform_indices = @transform_5, window_bounds = array<i64: 1, 128>}, {pipeline_mode = #tpu.pipeline_mode<synchronous>, transform_indices = @transform_6, window_bounds = array<i64: 1, 128>}, {transform_indices = @transform_7, window_bounds = array<i64: 8, 128>}]} {
    %c0_i32 = arith.constant 0 : i32
    %0 = arith.cmpi eq, %arg1, %c0_i32 : i32
    %1 = arith.extui %0 : i1 to i32
    %c0_i32_0 = arith.constant 0 : i32
    %2 = arith.cmpi ne, %1, %c0_i32_0 : i32
    scf.if %2 {
      %cst_16 = arith.constant 0.000000e+00 : f32
      %19 = vector.broadcast %cst_16 : f32 to vector<8x128xf32>
      %c0_17 = arith.constant 0 : index
      %c0_18 = arith.constant 0 : index
      %20 = vector.load %arg10[%c0_17, %c0_18] : memref<8x128xf32, #tpu.memory_space<vmem>>, vector<8x128xf32>
      tpu.vector_store %arg10[%c0_17, %c0_18], %19 {strides = array<i32>} : memref<8x128xf32, #tpu.memory_space<vmem>>, vector<8x128xf32>,
    } else {
    }
    %c0 = arith.constant 0 : index
    %c0_1 = arith.constant 0 : index
    %3 = vector.load %arg2[%c0, %c0_1] : memref<8x128xf32, #tpu.memory_space<vmem>>, vector<8x128xf32>
    %c0_2 = arith.constant 0 : index
    %c0_3 = arith.constant 0 : index
    %4 = vector.load %arg3[%c0_2, %c0_3] : memref<128x256xf32, #tpu.memory_space<vmem>>, vector<128x256xf32>
    %cst = arith.constant dense<0.000000e+00> : vector<8x256xf32>
    %5 = tpu.matmul %3, %4, %cst {dimension_numbers = #tpu.dot_dimension_numbers<[1], [0], [0], [1], [0, 0, 1, 1], [], []>} : vector<8x128xf32>, vector<128x256xf32>, vector<8x256xf32> -> vector<8x256xf32>
    %c0_4 = arith.constant 0 : index
    %c0_5 = arith.constant 0 : index
    %6 = vector.load %arg4[%c0_4, %c0_5] : memref<1x256xf32, #tpu.memory_space<vmem>>, vector<1x256xf32>
    %7 = vector.broadcast %6 : vector<1x256xf32> to vector<8x256xf32>
    %8 = arith.addf %5, %7 : vector<8x256xf32>
    %cst_6 = arith.constant 0.000000e+00 : f32
    %9 = vector.broadcast %cst_6 : f32 to vector<8x256xf32>
    %10 = arith.maximumf %8, %9 : vector<8x256xf32>
    %c0_7 = arith.constant 0 : index
    %c0_8 = arith.constant 0 : index
    %11 = vector.load %arg10[%c0_7, %c0_8] : memref<8x128xf32, #tpu.memory_space<vmem>>, vector<8x128xf32>
    %c0_9 = arith.constant 0 : index
    %c0_10 = arith.constant 0 : index
    %12 = vector.load %arg5[%c0_9, %c0_10] : memref<256x128xf32, #tpu.memory_space<vmem>>, vector<256x128xf32>
    %cst_11 = arith.constant dense<0.000000e+00> : vector<8x128xf32>
    %13 = tpu.matmul %10, %12, %cst_11 {dimension_numbers = #tpu.dot_dimension_numbers<[1], [0], [0], [1], [0, 0, 1, 1], [], []>} : vector<8x256xf32>, vector<256x128xf32>, vector<8x128xf32> -> vector<8x128xf32>
    %14 = arith.addf %11, %13 : vector<8x128xf32>
    %c0_12 = arith.constant 0 : index
    %c0_13 = arith.constant 0 : index
    %15 = vector.load %arg10[%c0_12, %c0_13] : memref<8x128xf32, #tpu.memory_space<vmem>>, vector<8x128xf32>
    tpu.vector_store %arg10[%c0_12, %c0_13], %14 {strides = array<i32>} : memref<8x128xf32, #tpu.memory_space<vmem>>, vector<8x128xf32>,
    %c0_i32_14 = arith.constant 0 : i32
    %16 = arith.cmpi eq, %arg1, %c0_i32_14 : i32
    %17 = arith.extui %16 : i1 to i32
    %c0_i32_15 = arith.constant 0 : i32
    %18 = arith.cmpi ne, %17, %c0_i32_15 : i32
    scf.if %18 {
      %c0_16 = arith.constant 0 : index
      %c0_17 = arith.constant 0 : index
      %19 = vector.load %arg10[%c0_16, %c0_17] : memref<8x128xf32, #tpu.memory_space<vmem>>, vector<8x128xf32>
      %c0_18 = arith.constant 0 : index
      %c0_19 = arith.constant 0 : index
      %20 = vector.load %arg6[%c0_18, %c0_19] : memref<1x128xf32, #tpu.memory_space<vmem>>, vector<1x128xf32>
      %21 = vector.broadcast %20 : vector<1x128xf32> to vector<8x128xf32>
      %22 = arith.addf %19, %21 : vector<8x128xf32>
      %23 = arith.addf %22, %3 : vector<8x128xf32>
      %cst_20 = arith.constant dense<0.000000e+00> : vector<8xf32>
      %24 = vector.multi_reduction <add>, %23, %cst_20 [1] : vector<8x128xf32> to vector<8xf32>
      %25 = vector.shape_cast %24 : vector<8xf32> to vector<8x1xf32>
      %cst_21 = arith.constant 1.280000e+02 : f32
      %26 = vector.broadcast %cst_21 : f32 to vector<8x1xf32>
      %27 = arith.divf %25, %26 : vector<8x1xf32>
      %28 = vector.broadcast %27 : vector<8x1xf32> to vector<8x128xf32>
      %29 = arith.subf %23, %28 : vector<8x128xf32>
      %30 = arith.mulf %29, %29 : vector<8x128xf32>
      %cst_22 = arith.constant dense<0.000000e+00> : vector<8xf32>
      %31 = vector.multi_reduction <add>, %30, %cst_22 [1] : vector<8x128xf32> to vector<8xf32>
      %32 = vector.shape_cast %31 : vector<8xf32> to vector<8x1xf32>
      %cst_23 = arith.constant 1.280000e+02 : f32
      %33 = vector.broadcast %cst_23 : f32 to vector<8x1xf32>
      %34 = arith.divf %32, %33 : vector<8x1xf32>
      %cst_24 = arith.constant 9.99999997E-7 : f32
      %35 = vector.broadcast %cst_24 : f32 to vector<8x1xf32>
      %36 = arith.addf %34, %35 : vector<8x1xf32>
      %37 = math.rsqrt %36 : vector<8x1xf32>
      %38 = vector.broadcast %37 : vector<8x1xf32> to vector<8x128xf32>
      %39 = arith.mulf %29, %38 : vector<8x128xf32>
      %c0_25 = arith.constant 0 : index
      %c0_26 = arith.constant 0 : index
      %40 = vector.load %arg7[%c0_25, %c0_26] : memref<1x128xf32, #tpu.memory_space<vmem>>, vector<1x128xf32>
      %41 = vector.broadcast %40 : vector<1x128xf32> to vector<8x128xf32>
      %42 = arith.mulf %39, %41 : vector<8x128xf32>
      %c0_27 = arith.constant 0 : index
      %c0_28 = arith.constant 0 : index
      %43 = vector.load %arg8[%c0_27, %c0_28] : memref<1x128xf32, #tpu.memory_space<vmem>>, vector<1x128xf32>
      %44 = vector.broadcast %43 : vector<1x128xf32> to vector<8x128xf32>
      %45 = arith.addf %42, %44 : vector<8x128xf32>
      %c0_29 = arith.constant 0 : index
      %c0_30 = arith.constant 0 : index
      %46 = vector.load %arg9[%c0_29, %c0_30] : memref<8x128xf32, #tpu.memory_space<vmem>>, vector<8x128xf32>
      tpu.vector_store %arg9[%c0_29, %c0_30], %45 {strides = array<i32>} : memref<8x128xf32, #tpu.memory_space<vmem>>, vector<8x128xf32>,
    } else {
    }
    return
  }
  func.func @transform_0(%arg0: i32, %arg1: i32) -> (i32, i32) {
    %c0_i32 = arith.constant 0 : i32
    %c0_i32_0 = arith.constant 0 : i32
    return %arg0, %c0_i32 : i32, i32
  }
  func.func @transform_1(%arg0: i32, %arg1: i32) -> (i32, i32) {
    %c0_i32 = arith.constant 0 : i32
    %c0_i32_0 = arith.constant 0 : i32
    return %c0_i32, %arg1 : i32, i32
  }
  func.func @transform_2(%arg0: i32, %arg1: i32) -> (i32, i32) {
    %c0_i32 = arith.constant 0 : i32
    %c0_i32_0 = arith.constant 0 : i32
    return %c0_i32, %arg1 : i32, i32
  }
  func.func @transform_3(%arg0: i32, %arg1: i32) -> (i32, i32) {
    %c0_i32 = arith.constant 0 : i32
    %c0_i32_0 = arith.constant 0 : i32
    return %arg1, %c0_i32 : i32, i32
  }
  func.func @transform_4(%arg0: i32, %arg1: i32) -> (i32, i32) {
    %c0_i32 = arith.constant 0 : i32
    %c0_i32_0 = arith.constant 0 : i32
    %c0_i32_1 = arith.constant 0 : i32
    return %c0_i32, %c0_i32_0 : i32, i32
  }
  func.func @transform_5(%arg0: i32, %arg1: i32) -> (i32, i32) {
    %c0_i32 = arith.constant 0 : i32
    %c0_i32_0 = arith.constant 0 : i32
    %c0_i32_1 = arith.constant 0 : i32
    return %c0_i32, %c0_i32_0 : i32, i32
  }
  func.func @transform_6(%arg0: i32, %arg1: i32) -> (i32, i32) {
    %c0_i32 = arith.constant 0 : i32
    %c0_i32_0 = arith.constant 0 : i32
    %c0_i32_1 = arith.constant 0 : i32
    return %c0_i32, %c0_i32_0 : i32, i32
  }
  func.func @transform_7(%arg0: i32, %arg1: i32) -> (i32, i32) {
    %c0_i32 = arith.constant 0 : i32
    %c0_i32_0 = arith.constant 0 : i32
    return %arg0, %c0_i32 : i32, i32
  }
}

</mosaic_0001>

<bundles_post_ra>
// kernel: tpu_custom_call.1
= control target key start
LH: loop header
LB: loop body
LE: loop exit
PB: predicated region body
PF: predicated region fallthrough
CT: control target
= control target key end

     0   :  { %12 = vsyncpa [#allocation4], 0  ;;  %s1471_s0 = inlined_call_operand.hbm [shape: f32[16,128], index: 0, kind: input, shape index: {}]   ;;  %s1472_s1 = inlined_call_operand.hbm [shape: f32[128,256], index: 1, kind: input, shape index: {}]   ;;  %s1473_s2 = inlined_call_operand.vmem [shape: f32[1,256], index: 2, kind: input, shape index: {}]   ;;  %s1474_s3 = inlined_call_operand.hbm [shape: f32[256,128], index: 3, kind: input, shape index: {}]   ;;  %s1475_s4 = inlined_call_operand.vmem [shape: f32[1,128], index: 4, kind: input, shape index: {}]   ;;  %s1476_s5 = inlined_call_operand.vmem [shape: f32[1,128], index: 5, kind: input, shape index: {}]   ;;  %s1477_s6 = inlined_call_operand.vmem [shape: f32[1,128], index: 6, kind: input, shape index: {}]   ;;  %s1478_s7 = inlined_call_operand.hbm [shape: f32[16,128], index: 7, kind: output, shape index: {}]  }
   0x1   :  { %14 = vsyncpa [#allocation4 + $0x1], 0 }
   0x2   :  { %15 = vsyncpa [#allocation7], 0 }
   0x3   :  { %16 = vsyncpa [#allocation5], 0 }
   0x4   :  { %18 = vsyncpa [#allocation5 + $0x1], 0  ;;  %s1202_s24 = smov 0   ;;  %s1204_s25 = smov 0  }
   0x5   :  { %s1206_s26 = smov 0   ;;  %s1208_s27 = smov 0  }
   0x6   :  { %s1210_s28 = smov 0   ;;  %s1212_s29 = smov 0  }
   0x7 LB: > { %1485 = sst [smem:[#allocation13_spill]] %s1131_s24  ;;  %s769_s30 = sadd.s32 4294967295, %s1151_s29   ;;  %s1151_s29 = sphi %s1212_s29, %s24_s29   ;;  %s1147_s28 = sphi %s1210_s28, %s1506_s28   ;;  %s1143_s27 = sphi %s1208_s27, %s1505_s27   ;;  %s1139_s26 = sphi %s1206_s26, %s1504_s26   ;;  %s1135_s25 = sphi %s1204_s25, %s1503_s25   ;;  %s1131_s24 = sphi %s1202_s24, %s1502_s24  }
   0x8   : > { %s770_s8 = sadd.s32 4294967294, %s1151_s29   ;;  %p56_p0 = scmp.ne.s32.totalorder %s1135_s25, %s1131_s24 }
   0x9   : > { %p1236_p1 = scmp.eq.s32.totalorder %s769_s30, 0  ;;  %p1240_p2 = scmp.eq.s32.totalorder %s769_s30, 1 }
   0xa   : > { %p227_p3 = scmp.eq.s32.totalorder %s770_s8, 1  ;;  %p771_p5 = scmp.ge.s32.totalorder %s1151_s29, 1 }
   0xb   : > { %s1486_s9 = scalar_select %p1236_p1, 1, 0 }
   0xc   : > { %p1246_p4 = por %p1236_p1, %p56_p0  ;;  %p1251_p6 = por %p227_p3, %p56_p0 }
   0xd   : > { %p234_p7 = scmp.lt.s32.totalorder %s1151_s29, 3  ;;  %s1153_s14 = smov [#allocation6]  }
   0xe   : > { %s1488_s11 = scalar_select %p1246_p4, 1, 0 }
   0xf   : > { %s1489_s12 = scalar_select %p1251_p6, 1, 0 }
  0x10   : > { %p1256_p8 = pnand %p771_p5, %p234_p7  ;;  %s249_s15 = sshll.u32 %s1153_s14, 4  ;;  %s1260_s15 = int_to_ptr.vmem [resolvable:$true] %s249_s15 }
  0x11   : > { %1490 = sst [smem:[#allocation14_spill]] %s1489_s12  ;;  %s1154_s17 = smov [#allocation8]  }
  0x12   : > { %p901_p9 = pneg %p1256_p8  ;;  %s273_s18 = sshll.u32 %s1154_s17, 4  ;;  %s1271_s18 = int_to_ptr.vmem [resolvable:$true] %s273_s18 }
  0x13   : > { %s979_s21 = scalar_lea.hbm %s1472_s1, 4096 }
  0x14   : > { %p1267_p11 = pnand %p901_p9, %p1236_p1  ;;  %p980_p12 = scmp.ne.s32.totalorder %s1472_s1, %s979_s21 }
  0x15   : > { %p986_p5 = scmp.lt.u32.totalorder %s979_s21, %s1472_s1 }
  0x16   : > { %p981_p13 = pneg %p1267_p11 }
  0x18   : > { %p982_p0 = pnand %p981_p13, %p980_p12 }
  0x1a   : > { %p983_p3 = pneg %p982_p0 }
  0x1c   : > { %p988_p7 = pnand %p986_p5, %p983_p3 }
  0x1e   : > { %991 = shalt.err (!%p988_p7)
}
  0x1f   : > { %s992_s14 = scalar_lea.vmem %s1260_s15, 4096  ;;  %p1000_p1 = scmp.lt.s32.totalorder %s1260_s15, %s1260_s15 }
  0x20   : > { %p993_p9 = scmp.ne.s32.totalorder %s1260_s15, %s992_s14  ;;  %p1001_p12 = scmp.lt.s32.totalorder %s992_s14, %s992_s14 }
  0x22   : > { %p995_p10 = pnand %p993_p9, %p981_p13  ;;  %p1002_p0 = por %p1001_p12, %p1000_p1 }
  0x24   : > { %p996_p6 = pneg %p995_p10 }
  0x26   : > { %p1003_p4 = pnand %p1002_p0, %p996_p6 }
  0x28   : > { %1006 = shalt.err (!%p1003_p4)
}
  0x29   : > { %s1155_s17 = smov 256   ;;  %s1156_s19 = smov 16  }
  0x2a   : > { %904 = dma.hbm_to_vmem [thread:$0]  (!%p1267_p11), %s1472_s1, 4096, %s1260_s15, [#allocation7], %s1155_s17, %s1155_s17, %s1156_s19  }
  0x2b   : > { %s1007_s30 = scalar_lea.hbm %s1474_s3, 4096 }
  0x2c   : > { %p1008_p1 = scmp.ne.s32.totalorder %s1474_s3, %s1007_s30  ;;  %p1014_p10 = scmp.lt.u32.totalorder %s1007_s30, %s1474_s3 }
  0x2e   : > { %p1010_p4 = pnand %p1008_p1, %p981_p13 }
  0x30   : > { %p1011_p6 = pneg %p1010_p4 }
  0x32   : > { %p1016_p3 = pnand %p1014_p10, %p1011_p6 }
  0x34   : > { %1019 = shalt.err (!%p1016_p3)
}
  0x35   : > { %s1020_s15 = scalar_lea.vmem %s1271_s18, 4096  ;;  %p1028_p12 = scmp.lt.s32.totalorder %s1271_s18, %s1271_s18 }
  0x36   : > { %p1021_p5 = scmp.ne.s32.totalorder %s1271_s18, %s1020_s15  ;;  %p1029_p0 = scmp.lt.s32.totalorder %s1020_s15, %s1020_s15 }
  0x38   : > { %p1023_p7 = pnand %p1021_p5, %p981_p13  ;;  %p1030_p1 = por %p1029_p0, %p1028_p12 }
  0x3a   : > { %p1024_p9 = pneg %p1023_p7 }
  0x3c   : > { %p1031_p4 = pnand %p1030_p1, %p1024_p9 }
  0x3e   : > { %1034 = shalt.err (!%p1031_p4)
}
  0x3f   : > { %s1157_s24 = smov 128   ;;  %s1158_s12 = smov 8  }
  0x40   : > { %907 = dma.hbm_to_vmem [thread:$0]  (!%p1267_p11), %s1474_s3, 4096, %s1271_s18, [#allocation7], %s1157_s24, %s1157_s24, %s1158_s12  }
  0x41   : > { %s36_s20 = sadd.s32 1, %s1147_s28  ;;  %s43_s21 = sadd.s32 1, %s1139_s26 }
  0x42   : > { %p38_p13 = scmp.ge.s32.totalorder %s36_s20, 2  ;;  %p50_p6 = scmp.ne.s32.totalorder %s1139_s26, %s1135_s25 }
  0x43   : > { %p51_p10 = scmp.eq.s32.totalorder %s1151_s29, 0  ;;  %p918_p3 = scmp.lt.s32.totalorder %s1151_s29, 2 }
  0x44   : > { %s1508_s20 = smov (%p38_p13, %s36_s20), 0  ;;  %p1335_p7 = por %p1240_p2, %p50_p6 }
  0x45   : > { %p52_p5 = por %p51_p10, %p50_p6  ;;  %s40_s16 = ssub.s32 %s1147_s28, %s1508_s20 }
  0x46   : > { %s1493_s22 = scalar_select %p1335_p7, 1, 0 }
  0x47   : > { %s296_s23 = sand.u32 1, %s1139_s26   ;;  %p41_p9 = scmp.eq.s32.totalorder %s40_s16, 0 }
  0x48   : > { %s776_s18 = sshll.u32 %s296_s23, 3  ;;  %s777_s30 = sshll.u32 %s1147_s28, 7 }
  0x49   : > { %s1344_s8 = scalar_select %p41_p9, %s1139_s26, %s43_s21  }
  0x4a   : > { %s1349_s24 = scalar_lea.hbm %s1471_s0, %s777_s30  ;;  %s300_s10 = scalar_lea.vmem [#allocation3], %s776_s18 }
  0x4b   : > { %s307_s12 = sshll.u32 %s300_s10, 4  ;;  %p1353_p2 = pnand %p918_p3, %p52_p5  ;;  %s1357_s12 = int_to_ptr.vmem [resolvable:$true] %s307_s12 }
  0x4c   : > { %s297_s19 = scalar_lea.sflag [#allocation4], %s296_s23  ;;  %s1035_s21 = scalar_lea.hbm %s1349_s24, 128 }
  0x4d   : > { %p1036_p11 = scmp.ne.s32.totalorder %s1349_s24, %s1035_s21  ;;  %p1037_p12 = pneg %p1353_p2 }
  0x4e   : > { %s1040_s30 = scalar_lea.hbm %s1471_s0, 256  ;;  %p1041_p4 = scmp.lt.u32.totalorder %s1349_s24, %s1471_s0 }
  0x4f   : > { %p1038_p0 = pnand %p1037_p12, %p1036_p11  ;;  %p1042_p13 = scmp.lt.u32.totalorder %s1040_s30, %s1035_s21 }
  0x50   : > { %p1044_p10 = scmp.lt.u32.totalorder %s1035_s21, %s1349_s24 }
  0x51   : > { %p1039_p1 = pneg %p1038_p0  ;;  %p1043_p6 = por %p1042_p13, %p1041_p4 }
  0x53   : > { %p1045_p3 = por %p1044_p10, %p1043_p6 }
  0x55   : > { %p1046_p5 = pnand %p1045_p3, %p1039_p1 }
  0x57   : > { %1049 = shalt.err (!%p1046_p5)
}
  0x58   : > { %s1050_s23 = scalar_lea.vmem %s1357_s12, 128  ;;  %s1159_s10 = smov [#allocation3]  }
  0x59   : > { %p1051_p9 = scmp.ne.s32.totalorder %s1357_s12, %s1050_s23  ;;  %s1055_s16 = sshll.u32 %s1159_s10, 4  ;;  %s1056_s16 = int_to_ptr.vmem [resolvable:$false] %s1055_s16 }
  0x5a   : > { %s1057_s18 = scalar_lea.vmem %s1056_s16, 256  ;;  %p1058_p7 = scmp.lt.s32.totalorder %s1357_s12, %s1056_s16 }
  0x5b   : > { %p1053_p11 = pnand %p1051_p9, %p1037_p12  ;;  %p1059_p4 = scmp.lt.s32.totalorder %s1057_s18, %s1050_s23 }
  0x5d   : > { %p1054_p0 = pneg %p1053_p11  ;;  %p1060_p13 = por %p1059_p4, %p1058_p7 }
  0x5f   : > { %p1061_p6 = pnand %p1060_p13, %p1054_p0 }
  0x61   : > { %1064 = shalt.err (!%p1061_p6)
}
  0x62   : > { %911 = dma.hbm_to_vmem [thread:$0]  (!%p1353_p2), %s1349_s24, 128, %s1357_s12, %s297_s19  }
  0x63   : > { %316 = sbr.rel (%p1256_p8) target bundleno = 907 (0x38b), region = 48  ;;  %s1387_s21 = sand.u32 (!%p1256_p8), 1, %s1135_s25  }
  0x64   : > { %s779_s30 = sshll.u32 (!%p1256_p8), %s1387_s21, 3  ;;  %s319_s14 = scalar_lea.sflag (!%p1256_p8), [#allocation4], %s1387_s21 }
  0x65   : > { %s1393_s15 = scalar_lea.vmem (!%p1256_p8), [#allocation3], %s779_s30  ;;  %p1495_p7 = scmp.ne.s32.totalorder (!%p1256_p8), %s1488_s11, 0 }
  0x6a   : > { %1118 = dma.done.wait (%p1495_p7), %s319_s14, 128  }
  0x6b   : > { %1120 = vsyncadd (%p1495_p7), %s319_s14, 4294967168  ;;  %p1496_p2 = scmp.ne.s32.totalorder %s1486_s9, 0 }
  0x6d   : > { %1122 = dma.done.wait (%p1496_p2), [#allocation7], 8192  }
  0x6e   : > { %1124 = vsyncadd (%p1496_p2), [#allocation7], 4294959104  ;;  %v1160_v0 = vmov 0.0   ;;  %v379_v1 = vld [vmem:[#allocation6 + $0x8] sm:$0xff]  ;;  %v381_v2 = vld [vmem:[#allocation6 + $0x18] sm:$0xff]  ;;  %s787_s10 = sshll.u32 %s1143_s27, 7 }
  0x6f   : > { %486 = vmatprep.mubr.f32.mxu0 %v1160_v0  ;;  %v378_v3 = vld [vmem:[#allocation6] sm:$0xff]  ;;  %v825_v4 = vpack.c.bf16 %v381_v2, %v379_v1  ;;  %v380_v5 = vld [vmem:[#allocation6 + $0x10] sm:$0xff]  ;;  %v383_v6 = vld [vmem:[#allocation6 + $0x28] sm:$0xff]  ;;  %s364_s16 = scalar_lea.vmem [#allocation9], %s779_s30  ;;  %s1422_s9 = scalar_lea.hbm %s1478_s7, %s787_s10 }
  0x70   : > { %v385_v7 = vld [vmem:[#allocation6 + $0x38] sm:$0xff]  ;;  %v827_v8 = vpack.c.bf16 %v380_v5, %v378_v3  ;;  %v382_v10 = vld [vmem:[#allocation6 + $0x20] sm:$0xff]  ;;  %v384_v11 = vld [vmem:[#allocation6 + $0x30] sm:$0xff]  ;;  %s656_s18 = sshll.u32 %s364_s16, 4  ;;  %s643_s11 = scalar_lea.sflag [#allocation5], %s1387_s21  ;;  %s1424_s18 = int_to_ptr.vmem [resolvable:$true] %s656_s18 }
  0x71   : > { %v829_v9 = vpack.c.bf16 %v385_v7, %v383_v6  ;;  %v387_v12 = vld [vmem:[#allocation6 + $0x48] sm:$0xff]  ;;  %826 = vmatprep.subr.bf16.mxu0 %v825_v4  ;;  %v389_v13 = vld [vmem:[#allocation6 + $0x58] sm:$0xff]  ;;  %v831_v14 = vpack.c.bf16 %v384_v11, %v382_v10  ;;  %v386_v16 = vld [vmem:[#allocation6 + $0x40] sm:$0xff]  ;;  %s1065_s13 = scalar_lea.vmem %s1424_s18, 128  ;;  %p1497_p12 = scmp.ne.s32.totalorder %s1493_s22, 0 }
  0x72   : > { %828 = vmatpush1.bf16.msra.mxu0 %v827_v8  ;;  %v833_v15 = vpack.c.bf16 %v389_v13, %v387_v12  ;;  %v388_v17 = vld [vmem:[#allocation6 + $0x50] sm:$0xff]  ;;  %v391_v18 = vld [vmem:[#allocation6 + $0x68] sm:$0xff]  ;;  %v393_v19 = vld [vmem:[#allocation6 + $0x78] sm:$0xff]  ;;  %p1066_p8 = scmp.ne.s32.totalorder %s1424_s18, %s1065_s13  ;;  %s1161_s27 = smov [#allocation9]  }
  0x73   : > { %830 = vmatprep.subr.bf16.mxu0 %v829_v9  ;;  %v835_v20 = vpack.c.bf16 %v388_v17, %v386_v16  ;;  %v837_v21 = vpack.c.bf16 %v393_v19, %v391_v18  ;;  %v390_v22 = vld [vmem:[#allocation6 + $0x60] sm:$0xff]  ;;  %v392_v23 = vld [vmem:[#allocation6 + $0x70] sm:$0xff]  ;;  %v395_v24 = vld [vmem:[#allocation6 + $0x88] sm:$0xff]  ;;  %s1069_s30 = sshll.u32 %s1161_s27, 4  ;;  %s1070_s30 = int_to_ptr.vmem [resolvable:$false] %s1069_s30 }
  0x74   : > { %v397_v25 = vld [vmem:[#allocation6 + $0x98] sm:$0xff]  ;;  %v394_v26 = vld [vmem:[#allocation6 + $0x80] sm:$0xff]  ;;  %v396_v27 = vld [vmem:[#allocation6 + $0x90] sm:$0xff]  ;;  %v839_v31 = vpack.c.bf16 %v392_v23, %v390_v22  ;;  %p1067_p1 = pnand %p1066_p8, %p1497_p12  ;;  %s1071_s24 = scalar_lea.vmem %s1070_s30, 256 }
  0x75   : > { %v512_v28 = vld [vmem:[#allocation8 + $0x80] sm:$0xff]  ;;  %v513_v29 = vld [vmem:[#allocation8 + $0x88] sm:$0xff]  ;;  %v514_v34 = vld [vmem:[#allocation8 + $0x90] sm:$0xff]  ;;  %v841_v36 = vpack.c.bf16 %v397_v25, %v395_v24  ;;  %v843_v46 = vpack.c.bf16 %v396_v27, %v394_v26  ;;  %p1072_p3 = scmp.lt.s32.totalorder %s1424_s18, %s1070_s30  ;;  %p1073_p5 = scmp.lt.s32.totalorder %s1071_s24, %s1065_s13 }
  0x76   : > { %832 = vmatpush1.bf16.msra.mxu0 %v831_v14  ;;  %v496_v30 = vld [vmem:[#allocation8] sm:$0xff]  ;;  %v857_v32 = vpack.c.bf16 %v513_v29, %v512_v28  ;;  %v497_v33 = vld [vmem:[#allocation8 + $0x8] sm:$0xff]  ;;  %v515_v35 = vld [vmem:[#allocation8 + $0x98] sm:$0xff]  ;;  %p1068_p10 = pneg %p1067_p1 }
  0x77   : > { %834 = vmatprep.subr.bf16.mxu0 %v833_v15  ;;  %v859_v37 = vpack.c.bf16 %v497_v33, %v496_v30  ;;  %v861_v38 = vpack.c.bf16 %v515_v35, %v514_v34  ;;  %v498_v39 = vld [vmem:[#allocation8 + $0x10] sm:$0xff]  ;;  %v499_v40 = vld [vmem:[#allocation8 + $0x18] sm:$0xff]  ;;  %v516_v41 = vld [vmem:[#allocation8 + $0xa0] sm:$0xff]  ;;  %v412_v34 = vlaneseq  ;;  %p1074_p9 = por %p1073_p5, %p1072_p3 }
  0x78   : > { %v399_v42 = vld [vmem:[#allocation6 + $0xa8] sm:$0xff]  ;;  %v401_v43 = vld [vmem:[#allocation6 + $0xb8] sm:$0xff]  ;;  %858 = vmatprep.subr.bf16.mxu1 %v857_v32  ;;  %v863_v45 = vpack.c.bf16 %v499_v40, %v498_v39  ;;  %v398_v47 = vld [vmem:[#allocation6 + $0xa0] sm:$0xff] }
  0x79   : > { %v517_v44 = vld [vmem:[#allocation8 + $0xa8] sm:$0xff]  ;;  %860 = vmatpush3.bf16.msra.mxu1 %v859_v37  ;;  %v500_v49 = vld [vmem:[#allocation8 + $0x20] sm:$0xff]  ;;  %v845_v51 = vpack.c.bf16 %v401_v43, %v399_v42  ;;  %v400_v52 = vld [vmem:[#allocation6 + $0xb0] sm:$0xff]  ;;  %v413_v35 = vshrl.u32 %v412_v34, 7  ;;  %p1075_p11 = pnand %p1074_p9, %p1068_p10 }
  0x7a   : > { %836 = vmatpush1.bf16.msra.mxu0 %v835_v20  ;;  %862 = vmatprep.subr.bf16.mxu1 %v861_v38  ;;  %v865_v48 = vpack.c.bf16 %v517_v44, %v516_v41  ;;  %v501_v50 = vld [vmem:[#allocation8 + $0x28] sm:$0xff]  ;;  %v518_v53 = vld [vmem:[#allocation8 + $0xb0] sm:$0xff]  ;;  %v519_v54 = vld [vmem:[#allocation8 + $0xb8] sm:$0xff]  ;;  %v847_v58 = vpack.c.bf16 %v400_v52, %v398_v47 }
  0x7b   : > { %838 = vmatprep.subr.bf16.mxu0 %v837_v21  ;;  %v403_v55 = vld [vmem:[#allocation6 + $0xc8] sm:$0xff]  ;;  %v405_v56 = vld [vmem:[#allocation6 + $0xd8] sm:$0xff]  ;;  %v867_v57 = vpack.c.bf16 %v501_v50, %v500_v49  ;;  %v402_v59 = vld [vmem:[#allocation6 + $0xc0] sm:$0xff]  ;;  %v869_v60 = vpack.c.bf16 %v519_v54, %v518_v53  ;;  %v418_v38 = vsub.s32 1, %v413_v35 }
  0x7c   : > { %v502_v61 = vld [vmem:[#allocation8 + $0x30] sm:$0xff]  ;;  %v503_v62 = vld [vmem:[#allocation8 + $0x38] sm:$0xff]  ;;  %v849_v63 = vpack.c.bf16 %v405_v56, %v403_v55  ;;  %v520_v1 = vld [vmem:[#allocation8 + $0xc0] sm:$0xff] }
  0x7d   : > { %864 = vmatpush3.bf16.msra.mxu1 %v863_v45  ;;  %v404_v0 = vld [vmem:[#allocation6 + $0xd0] sm:$0xff]  ;;  %v521_v2 = vld [vmem:[#allocation8 + $0xc8] sm:$0xff]  ;;  %v409_v4 = vld [vmem:[#allocation6 + $0xf8] sm:$0xff]  ;;  %v871_v5 = vpack.c.bf16 %v503_v62, %v502_v61 }
  0x7e   : > { %840 = vmatpush1.bf16.msra.mxu0 %v839_v31  ;;  %866 = vmatprep.subr.bf16.mxu1 %v865_v48  ;;  %v407_v3 = vld [vmem:[#allocation6 + $0xe8] sm:$0xff]  ;;  %v851_v6 = vpack.c.bf16 %v404_v0, %v402_v59  ;;  %v406_v7 = vld [vmem:[#allocation6 + $0xe0] sm:$0xff]  ;;  %v873_v8 = vpack.c.bf16 %v521_v2, %v520_v1  ;;  %v408_v12 = vld [vmem:[#allocation6 + $0xf0] sm:$0xff] }
  0x7f   : > { %842 = vmatprep.subr.bf16.mxu0 %v841_v36  ;;  %v504_v9 = vld [vmem:[#allocation8 + $0x40] sm:$0xff]  ;;  %v505_v10 = vld [vmem:[#allocation8 + $0x48] sm:$0xff]  ;;  %v853_v11 = vpack.c.bf16 %v409_v4, %v407_v3  ;;  %v522_v13 = vld [vmem:[#allocation8 + $0xd0] sm:$0xff]  ;;  %v855_v16 = vpack.c.bf16 %v408_v12, %v406_v7  ;;  %v414_v36 = vsub.s32 0, %v413_v35 }
  0x80   : > { %v523_v14 = vld [vmem:[#allocation8 + $0xd8] sm:$0xff]  ;;  %v875_v15 = vpack.c.bf16 %v505_v10, %v504_v9  ;;  %v506_v18 = vld [vmem:[#allocation8 + $0x50] sm:$0xff]  ;;  %v524_v20 = vld [vmem:[#allocation8 + $0xe0] sm:$0xff] }
  0x81   : > { %868 = vmatpush3.bf16.msra.mxu1 %v867_v57  ;;  %v877_v17 = vpack.c.bf16 %v523_v14, %v522_v13  ;;  %v507_v19 = vld [vmem:[#allocation8 + $0x58] sm:$0xff]  ;;  %v525_v21 = vld [vmem:[#allocation8 + $0xe8] sm:$0xff]  ;;  %v508_v25 = vld [vmem:[#allocation8 + $0x60] sm:$0xff] }
  0x82   : > { %844 = vmatpush1.bf16.msra.mxu0 %v843_v46  ;;  %870 = vmatprep.subr.bf16.mxu1 %v869_v60  ;;  %v879_v22 = vpack.c.bf16 %v507_v19, %v506_v18  ;;  %v377_v23 = vld [vmem:[%s1393_s15] sm:$0xff]  ;;  %v881_v24 = vpack.c.bf16 %v525_v21, %v524_v20  ;;  %v509_v26 = vld [vmem:[#allocation8 + $0x68] sm:$0xff] }
  0x83   : > { %846 = vmatprep.subr.bf16.mxu0 %v845_v51  ;;  %v883_v27 = vpack.c.bf16 %v509_v26, %v508_v25  ;;  %v526_v28 = vld [vmem:[#allocation8 + $0xf0] sm:$0xff]  ;;  %v527_v29 = vld [vmem:[#allocation8 + $0xf8] sm:$0xff] }
  0x84   : > { %v885_v30 = vpack.c.bf16 %v527_v29, %v526_v28  ;;  %v510_v31 = vld [vmem:[#allocation8 + $0x70] sm:$0xff]  ;;  %v511_v32 = vld [vmem:[#allocation8 + $0x78] sm:$0xff] }
  0x85   : > { %872 = vmatpush3.bf16.msra.mxu1 %v871_v5  ;;  %v887_v33 = vpack.c.bf16 %v511_v32, %v510_v31  ;;  %v410_v37 = vld [vmem:[%s1473_s2] sm:$0x3] }
  0x86   : > { %848 = vmatpush1.bf16.msra.mxu0 %v847_v58  ;;  %874 = vmatprep.subr.bf16.mxu1 %v873_v8  ;;  %v415_v39 = vrot.slane %v410_v37, %v414_v36  ;;  %v419_v40 = vrot.slane %v410_v37, %v418_v38  ;;  %v783_v49 = vld [vmem:[%s1475_s4] ss:$0 sm:$0xff] }
  0x87   : > { %850 = vmatprep.subr.bf16.mxu0 %v849_v63  ;;  %v784_v61 = vld [vmem:[%s1476_s5] ss:$0 sm:$0xff] }
  0x88   : > { %v785_v63 = vld [vmem:[%s1477_s6] ss:$0 sm:$0xff] }
  0x89   : > { %876 = vmatpush3.bf16.msra.mxu1 %v875_v15 }
  0x8a   : > { %852 = vmatpush1.bf16.msra.mxu0 %v851_v6  ;;  %878 = vmatprep.subr.bf16.mxu1 %v877_v17 }
  0x8b   : > { %854 = vmatprep.subr.bf16.mxu0 %v853_v11 }
  0x8d   : > { %880 = vmatpush3.bf16.msra.mxu1 %v879_v22 }
  0x8e   : > { %856 = vmatpush1.bf16.msra.mxu0 %v855_v16  ;;  %882 = vmatprep.subr.bf16.mxu1 %v881_v24 }
  0x91   : > { %487 = vmatmul.mubr.f32.vlgmr.msra.gmra.mrb[0].mxu0 %v377_v23  ;;  %884 = vmatpush3.bf16.msra.mxu1 %v883_v27 }
  0x92   : > { %886 = vmatprep.subr.bf16.mxu1 %v885_v30 }
  0x95   : > { %888 = vmatpush3.bf16.msra.mxu1 %v887_v33 }
 0x164   : > { %v488_v41 = vpop.f32.mrb[0].mxu0 }
 0x165   : > { %v489_v42 = vadd.f32 %v488_v41, %v415_v39  ;;  %v490_v43 = vpop.f32.mrb[1].mxu0 }
 0x166   : > { %v491_v44 = vadd.f32 %v490_v43, %v419_v40 }
 0x167   : > { %v493_v46 = vmax.f32 %v489_v42, 0.0 }
 0x168   : > { %v494_v45 = vmax.f32 %v491_v44, 0.0 }
 0x16a   : > { %592 = vmatprep.mubr.f32.mxu1 %v494_v45 }
 0x16b   : > { %593 = vmatmul.mubr.f32.vlgmr.msra.gmra.mrb[0].mxu1 %v493_v46 }
 0x23e   : > { %v822_v47 = vpop.f32.mrb[0].mxu1 }
 0x23f   : > { %v823_v48 = vpop.f32.mrb[1].mxu1 }
 0x240   : > { %v824_v50 = vadd.f32 %v823_v48, %v822_v47 }
 0x242   : > { %v611_v51 = vadd.f32 %v824_v50, %v783_v49 }
 0x244   : > { %v612_v52 = vadd.f32 %v611_v51, %v377_v23 }
 0x246   : > { %613 = vadd.xlane.f32.xlu0 %v612_v52 }
 0x2d3   : > { %v614_v53 = vpop.xlane.xlu0 %613 }
 0x2d4   : > { %v616_v54 = vmul.f32 0.0078125, %v614_v53 }
 0x2d6   : > { %v617_v55 = vsub.f32 %v612_v52, %v616_v54 }
 0x2d8   : > { %v618_v56 = vmul.f32 %v617_v55, %v617_v55 }
 0x2da   : > { %619 = vadd.xlane.f32.xlu0 %v618_v56 }
 0x367   : > { %v620_v57 = vpop.xlane.xlu0 %619 }
 0x368   : > { %v621_v58 = vmul.f32 0.0078125, %v620_v57 }
 0x36a   : > { %v622_v59 = vadd.f32 1e-06, %v621_v58 }
 0x36c   : > { %977 = vrsqrt.f32 %v622_v59 }
 0x376   : > { %v978_v60 = vpop.eup %977 }
 0x377   : > { %v624_v62 = vmul.f32 %v978_v60, %v617_v55 }
 0x379   : > { %v632_v0 = vmul.f32 %v784_v61, %v624_v62 }
 0x37b   : > { %v640_v1 = vadd.f32 %v785_v63, %v632_v0 }
 0x37d   : > { %641 = vst [vmem:[%s364_s16] sm:$0xff] %v640_v1 }
 0x37e   : > { %1078 = shalt.err (!%p1075_p11)
}
 0x37f   : > { %s1079_s21 = scalar_lea.hbm %s1422_s9, 128  ;;  %s1083_s19 = scalar_lea.hbm %s1478_s7, 256 }
 0x380   : > { %p1080_p0 = scmp.ne.s32.totalorder %s1422_s9, %s1079_s21  ;;  %p1084_p6 = scmp.lt.u32.totalorder %s1422_s9, %s1478_s7 }
 0x381   : > { %p1085_p7 = scmp.lt.u32.totalorder %s1083_s19, %s1079_s21  ;;  %p1087_p8 = scmp.lt.u32.totalorder %s1079_s21, %s1422_s9 }
 0x382   : > { %p1081_p4 = pnand %p1080_p0, %p1497_p12 }
 0x383   : > { %p1086_p2 = por %p1085_p7, %p1084_p6 }
 0x384   : > { %p1082_p13 = pneg %p1081_p4 }
 0x385   : > { %p1088_p1 = por %p1087_p8, %p1086_p2 }
 0x387   : > { %p1089_p10 = pnand %p1088_p1, %p1082_p13 }
 0x389   : > { %1092 = shalt.err (!%p1089_p10)
}
 0x38a   : > { %899 = dma.vmem_to_hbm [thread:$0]  (%p1497_p12), %s1424_s18, 128, %s1422_s9, %s643_s11  }
 0x38b PF: > { %s1498_s16 = sld [smem:[#allocation13_spill]]  ;;  %s1499_s14 = sld [smem:[#allocation14_spill]] }
 0x38c   : > { %p1501_p5 = scmp.ge.s32.totalorder %s1151_s29, 2 }
 0x391   : > { %s668_s15 = sand.u32 1, %s1498_s16   ;;  %p1500_p3 = scmp.ne.s32.totalorder %s1499_s14, 0 }
 0x392   : > { %s669_s13 = scalar_lea.sflag [#allocation5], %s668_s15 }
 0x393   : > { %p913_p9 = pnand %p1501_p5, %p1500_p3 }
 0x395   : > { %1126 = dma.done.wait (!%p913_p9), %s669_s13, 128  }
 0x396   : > { %1128 = vsyncadd (!%p913_p9), %s669_s13, 4294967168  ;;  %s24_s29 = sadd.s32 1, %s1151_s29   ;;  %s1502_s24 = smov %s1135_s25 }
 0x397   : > { %p21_p11 = scmp.ge.s32.totalorder %s24_s29, 4   ;;  %s1503_s25 = smov %s1139_s26 }
 0x398   : > { %s1504_s26 = smov %s1344_s8  ;;  %s1505_s27 = smov %s1147_s28 }
 0x399   : > { %s1506_s28 = smov %s1508_s20  ;;  %23 = sbr.rel (!%p21_p11) target bundleno = 7 (0x7), region = 114 }
 0x3a0   :  { %674 = vsyncpa [#allocation4], 1 }
 0x3a1   :  { %676 = vsyncpa [#allocation4 + $0x1], 1 }
 0x3a2   :  { %677 = vsyncpa [#allocation7], 1 }
 0x3a3   :  { %678 = vsyncpa [#allocation5], 1 }
 0x3a4   :  { %680 = vsyncpa [#allocation5 + $0x1], 1 }

</bundles_post_ra>
